<compile_context>
chip_gen: v7x
topology: tpu7x:2x2x1
jax: 0.10.0
libtpu: 0.0.40
codegen_flags: <defaults>
</compile_context>

<pallas_src>
import numpy as np

import jax
import jax.numpy as jnp
from jax import lax
from jax.experimental import pallas as pl
from jax.experimental.pallas import tpu as pltpu


def _make_kernel(in_dim, feat_dim, out_dim, tile_n):
    two_f = 2 * feat_dim

    def kernel(x_ref, scale_ref, o_ref):
        # x_ref:     (1, in_dim, tile_n)  VMEM tile (one batch element, one N tile)
        # scale_ref: (out_dim, 1)         per-output-row scale = beta / alpha^(f/feat_dim)
        # o_ref:     (1, out_dim, tile_n) VMEM output tile
        x = x_ref[0]                                                   # (in_dim, tile_n)

        # Expand channels so output row r sees channel r // (2*feat_dim):
        # sublane-broadcast each channel row to 2*feat_dim rows, then concatenate.
        xe = jnp.concatenate(
            [jnp.broadcast_to(x[c:c + 1, :], (two_f, tile_n)) for c in range(in_dim)],
            axis=0)                                                    # (out_dim, tile_n)

        # Single hoisted scale multiply, broadcast along lanes.
        arg = xe * scale_ref[...]                                      # (out_dim, tile_n)

        # Even rows -> sin, odd rows -> cos (PyTorch's interleaved stack layout).
        # Dense sin/cos over the whole block, then one full-tile dense store.
        row = lax.broadcasted_iota(jnp.int32, (out_dim, tile_n), 0)
        o_ref[0] = jnp.where((row & 1) == 1, jnp.cos(arg), jnp.sin(arg))

    return kernel


def _pick_tile_n(N):
    """Largest lane-dense N tile (multiple of 128, capped at 4096) that divides N."""
    if N <= 4096:
        return N
    for cand in (4096, 2048, 1024, 512, 256, 128):
        if N % cand == 0:
            return cand
    return N  # ragged N: fall back to a single full-width block


def pose_initial(xyz, out_dim, alpha, beta):
    """Pallas implementation of PosE_Initial.forward. xyz: (B, in_dim, N) float32."""
    B, in_dim, N = xyz.shape
    feat_dim = out_dim // (in_dim * 2)
    assert out_dim == in_dim * 2 * feat_dim, "out_dim must be divisible by 2*in_dim"

    tile_n = _pick_tile_n(N)
    num_n_tiles = N // tile_n

    # Correctly-rounded f32 scale constants: beta / alpha^(f/feat_dim). Each frequency
    # appears twice (sin row + cos row), tiled once per input channel -> (out_dim, 1).
    scales = np.array(
        [float(beta) / float(alpha) ** (f / feat_dim) for f in range(feat_dim)],
        dtype=np.float32)
    scale_rows = jnp.asarray(
        np.tile(np.repeat(scales, 2), in_dim).reshape(out_dim, 1))

    kernel = _make_kernel(in_dim, feat_dim, out_dim, tile_n)

    return pl.pallas_call(
        kernel,
        out_shape=jax.ShapeDtypeStruct((B, out_dim, N), jnp.float32),
        grid_spec=pltpu.PrefetchScalarGridSpec(
            num_scalar_prefetch=0,
            grid=(B, num_n_tiles),
            in_specs=[
                pl.BlockSpec((1, in_dim, tile_n), lambda b, nt: (b, 0, nt)),
                pl.BlockSpec((out_dim, 1), lambda b, nt: (0, 0)),
            ],
            out_specs=pl.BlockSpec((1, out_dim, tile_n), lambda b, nt: (b, 0, nt)),
        ),
        compiler_params=pltpu.CompilerParams(
            dimension_semantics=("parallel", "parallel")),
    )(xyz, scale_rows)


def pose_initial_ref(xyz, out_dim, alpha, beta):
    """Pure-JAX reference mirroring the PyTorch forward exactly."""
    B, in_dim, N = xyz.shape
    feat_dim = out_dim // (in_dim * 2)
    feat_range = jnp.arange(feat_dim, dtype=jnp.float32)
    dim_embed = jnp.power(jnp.float32(alpha), feat_range / feat_dim)          # (feat_dim,)
    div_embed = (beta * xyz[..., None]) / dim_embed                           # (B, in_dim, N, feat_dim)
    sin_e = jnp.sin(div_embed)
    cos_e = jnp.cos(div_embed)
    pe = jnp.stack([sin_e, cos_e], axis=4).reshape(B, in_dim, N, feat_dim * 2)
    pe = jnp.transpose(pe, (0, 1, 3, 2)).reshape(B, out_dim, N)
    return pe


if __name__ == "__main__":
    # Small shapes consistent with the module: 3-D points, 128 points per cloud.
    B, in_dim, N = 2, 3, 128
    feat_dim = 6
    out_dim = in_dim * 2 * feat_dim          # 36
    alpha, beta = 1000.0, 100.0

    key = jax.random.PRNGKey(0)
    xyz = jax.random.normal(key, (B, in_dim, N), dtype=jnp.float32)

    out = jax.block_until_ready(pose_initial(xyz, out_dim, alpha, beta))
    ref = pose_initial_ref(xyz, out_dim, alpha, beta)

    assert out.shape == (B, out_dim, N)
    assert jnp.allclose(out, ref, atol=1e-5, rtol=1e-5), "mismatch vs reference"

    print("KERNEL_OK")
</pallas_src>

<mosaic_0001>
module attributes {stable_mosaic.version = 11 : i64} {
  func.func @kernel(%arg0: i32, %arg1: i32, %arg2: memref<1x3x128xf32, #tpu.memory_space<vmem>>, %arg3: memref<36x1xf32, #tpu.memory_space<vmem>>, %arg4: memref<1x36x128xf32, #tpu.memory_space<vmem>>) attributes {dimension_semantics = [#tpu.dimension_semantics<parallel>, #tpu.dimension_semantics<parallel>], iteration_bounds = array<i64: 2, 1>, scalar_prefetch = 0 : i64, scratch_operands = 0 : i64, tpu.core_type = #tpu.core_type<tc>, window_params = [{transform_indices = @transform_0, window_bounds = array<i64: 1, 3, 128>}, {pipeline_mode = #tpu.pipeline_mode<synchronous>, transform_indices = @transform_1, window_bounds = array<i64: 36, 1>}, {transform_indices = @transform_2, window_bounds = array<i64: 1, 36, 128>}]} {
    %c0 = arith.constant 0 : index
    %c0_0 = arith.constant 0 : index
    %c0_1 = arith.constant 0 : index
    %0 = vector.load %arg2[%c0, %c0_0, %c0_1] : memref<1x3x128xf32, #tpu.memory_space<vmem>>, vector<1x3x128xf32>
    %1 = vector.shape_cast %0 : vector<1x3x128xf32> to vector<3x128xf32>
    %2 = vector.extract_strided_slice %1 {offsets = [0, 0], sizes = [1, 128], strides = [1, 1]} : vector<3x128xf32> to vector<1x128xf32>
    %3 = vector.shape_cast %2 : vector<1x128xf32> to vector<1x128xf32>
    %4 = vector.broadcast %3 : vector<1x128xf32> to vector<12x128xf32>
    %5 = vector.extract_strided_slice %1 {offsets = [1, 0], sizes = [1, 128], strides = [1, 1]} : vector<3x128xf32> to vector<1x128xf32>
    %6 = vector.shape_cast %5 : vector<1x128xf32> to vector<1x128xf32>
    %7 = vector.broadcast %6 : vector<1x128xf32> to vector<12x128xf32>
    %8 = vector.extract_strided_slice %1 {offsets = [2, 0], sizes = [1, 128], strides = [1, 1]} : vector<3x128xf32> to vector<1x128xf32>
    %9 = vector.shape_cast %8 : vector<1x128xf32> to vector<1x128xf32>
    %10 = vector.broadcast %9 : vector<1x128xf32> to vector<12x128xf32>
    %11 = tpu.concatenate %4, %7, %10 in 0 : vector<12x128xf32>, vector<12x128xf32>, vector<12x128xf32> -> vector<36x128xf32>
    %c0_2 = arith.constant 0 : index
    %c0_3 = arith.constant 0 : index
    %12 = vector.load %arg3[%c0_2, %c0_3] : memref<36x1xf32, #tpu.memory_space<vmem>>, vector<36x1xf32>
    %13 = vector.broadcast %12 : vector<36x1xf32> to vector<36x128xf32>
    %14 = arith.mulf %11, %13 : vector<36x128xf32>
    %15 = tpu.iota {dimensions = array<i32: 0>} : vector<36x128xi32>
    %c1_i32 = arith.constant 1 : i32
    %16 = vector.broadcast %c1_i32 : i32 to vector<36x128xi32>
    %17 = arith.andi %15, %16 : vector<36x128xi32>
    %c1_i32_4 = arith.constant 1 : i32
    %18 = vector.broadcast %c1_i32_4 : i32 to vector<36x128xi32>
    %19 = arith.cmpi eq, %17, %18 : vector<36x128xi32>
    %20 = math.cos %14 : vector<36x128xf32>
    %21 = math.sin %14 : vector<36x128xf32>
    %22 = arith.select %19, %20, %21 : vector<36x128xi1>, vector<36x128xf32>
    %c0_5 = arith.constant 0 : index
    %c0_6 = arith.constant 0 : index
    %c0_7 = arith.constant 0 : index
    %23 = vector.load %arg4[%c0_5, %c0_6, %c0_7] : memref<1x36x128xf32, #tpu.memory_space<vmem>>, vector<1x36x128xf32>
    %24 = vector.shape_cast %23 : vector<1x36x128xf32> to vector<36x128xf32>
    %25 = vector.shape_cast %22 : vector<36x128xf32> to vector<1x36x128xf32>
    tpu.vector_store %arg4[%c0_5, %c0_6, %c0_7], %25 {strides = array<i32>} : memref<1x36x128xf32, #tpu.memory_space<vmem>>, vector<1x36x128xf32>,
    return
  }
  func.func @transform_0(%arg0: i32, %arg1: i32) -> (i32, i32, i32) {
    %c0_i32 = arith.constant 0 : i32
    %c0_i32_0 = arith.constant 0 : i32
    return %arg0, %c0_i32, %arg1 : i32, i32, i32
  }
  func.func @transform_1(%arg0: i32, %arg1: i32) -> (i32, i32) {
    %c0_i32 = arith.constant 0 : i32
    %c0_i32_0 = arith.constant 0 : i32
    %c0_i32_1 = arith.constant 0 : i32
    return %c0_i32, %c0_i32_0 : i32, i32
  }
  func.func @transform_2(%arg0: i32, %arg1: i32) -> (i32, i32, i32) {
    %c0_i32 = arith.constant 0 : i32
    %c0_i32_0 = arith.constant 0 : i32
    return %arg0, %c0_i32, %arg1 : i32, i32, i32
  }
}

</mosaic_0001>

<bundles_post_ra>
// kernel: tpu_custom_call.1
= control target key start
LH: loop header
LB: loop body
LE: loop exit
PB: predicated region body
PF: predicated region fallthrough
CT: control target
= control target key end

     0   :  { %s1532_s9 = smov 0   ;;  %s1534_s10 = smov 0   ;;  %s2070_s0 = inlined_call_operand.vmem [shape: f32[2,3,128], index: 0, kind: input, shape index: {}]   ;;  %s2071_s1 = inlined_call_operand.vmem [shape: f32[36,1], index: 1, kind: input, shape index: {}]   ;;  %s2072_s2 = inlined_call_operand.vmem [shape: f32[2,36,128], index: 2, kind: output, shape index: {}]  }
   0x1   :  { %s1536_s11 = smov 0  }
   0x2 LB: > { %s24_s12 = sadd.s32 1, %s1504_s10  ;;  %p1367_p0 = scmp.ge.s32.totalorder %s1508_s11, 1  ;;  %s1508_s11 = sphi %s1536_s11, %s12_s11   ;;  %s1504_s10 = sphi %s1534_s10, %s2090_s10   ;;  %s1500_s9 = sphi %s1532_s9, %s2089_s9  }
   0x3   : > { %p26_p1 = scmp.ge.s32.totalorder %s24_s12, 2  ;;  %p130_p2 = scmp.lt.s32.totalorder %s1508_s11, 3 }
   0x5   : > { %s2092_s12 = smov (%p26_p1, %s24_s12), 0  ;;  %p131_p3 = pnand %p1367_p0, %p130_p2 }
   0x6   : > { %v189_v0 = vld [vmem:[%s2071_s1 + $0x10] sm:$0xff] (!%p131_p3)  ;;  %v187_v1 = vld [vmem:[%s2071_s1] sm:$0xff] (!%p131_p3)  ;;  %v1510_v2 = vmov (!%p131_p3), 0   ;;  %v190_v3 = vld [vmem:[%s2071_s1 + $0x18] sm:$0xff] (!%p131_p3)  ;;  %p157_p4 = scmp.lt.s32.totalorder (!%p131_p3), %s1500_s9, 1  ;;  %v173_v6 = vlaneseq (!%p131_p3)  ;;  %vm185_vm0 = vcmask (!%p131_p3), 1043456  }
   0x7   : > { %134 = sbr.rel (%p131_p3) target bundleno = 310 (0x136), region = 28  ;;  %1465 = vset.pattern.permute.xlu1 (!%p131_p3), %v1510_v2  ;;  %1464 = vset.pattern.permute.xlu0 (!%p131_p3), %v1510_v2  ;;  %v188_v4 = vld [vmem:[%s2071_s1 + $0x8] sm:$0xff] (!%p131_p3)  ;;  %v191_v5 = vld [vmem:[%s2071_s1 + $0x20] sm:$0xf] (!%p131_p3)  ;;  %v1511_v48 = vmov (!%p131_p3), 683565275  }
   0x8   : > { %204 = vperm.xlu1 (!%p131_p3), %1465, %v189_v0   ;;  %194 = vperm.xlu0 (!%p131_p3), %1464, %v187_v1   ;;  %v1568_v7 = vshrl.u32 (!%p131_p3), %v173_v6, 7  ;;  %v1512_v50 = vmov (!%p131_p3), 2475754826   ;;  %v1513_v52 = vmov (!%p131_p3), 2131351028  }
   0x9   : > { %v1514_v54 = vmov (!%p131_p3), 2102212464   ;;  %v1515_v56 = vmov (!%p131_p3), 920167782   ;;  %v1516_v1 = vmov (!%p131_p3), 1326507024  }
   0xa   : > { %v179_v8 = vsub.s32 (!%p131_p3), 1, %v1568_v7  ;;  %v175_v9 = vsub.s32 (!%p131_p3), 0, %v1568_v7  ;;  %v183_v13 = vsub.s32 (!%p131_p3), 2, %v1568_v7 }
   0xc   : > { %209 = vperm.xlu1 (!%p131_p3), %1465, %v190_v3   ;;  %199 = vperm.xlu0 (!%p131_p3), %1464, %v188_v4  }
   0xe   : > { %s2094_s9 = smov (!%p157_p4, %s1500_s9), 1 }
   0xf   : > { %s1368_s23 = sshll.u32 %s2094_s9, 2  ;;  %s1412_s27 = smul.u32 40, %s2094_s9 }
  0x10   : > { %214 = vperm.xlu0 %1464, %v191_v5   ;;  %s163_s26 = scalar_lea.vmem %s2070_s0, %s1368_s23 }
  0x11   : > { %v172_v10 = vld [vmem:[%s163_s26] sm:$0x7]  ;;  %s1867_s30 = scalar_lea.vmem %s2072_s2, %s1412_s27 }
  0x12   : > { %v180_v11 = vrot.slane %v172_v10, %v179_v8  ;;  %v176_v12 = vrot.slane %v172_v10, %v175_v9  ;;  %v1580_v18 = vrot.slane %v172_v10, %v183_v13 }
  0x14   : > { %v1595_v42 = vsel %vm185_vm0, %v176_v12, %v180_v11 }
  0x87   : > { %v205_v14 = vpop.permute.xlu1 %204  ;;  %v195_v15 = vpop.permute.xlu0 %194 }
  0x88   : > { %v1576_v16 = vmul.f32 %v205_v14, %v180_v11  ;;  %v1578_v17 = vmul.f32 %v195_v15, %v176_v12 }
  0x8a   : > { %v444_v19 = vand.u32 2147483647, %v1576_v16  ;;  %v447_v20 = vand.u32 2139095040, %v1576_v16  ;;  %v238_v21 = vand.u32 2147483647, %v1578_v17  ;;  %v241_v22 = vand.u32 2139095040, %v1578_v17 }
  0x8b   : > { %v210_v23 = vpop.permute.xlu1 %209  ;;  %vm446_vm15 = vcmp.lt.s32.totalorder %v1576_v16, 0 }
  0x8c   : > { %v448_v24 = vshrl.u32 %v447_v20, 23  ;;  %v1587_v25 = vmul.f32 %v210_v23, %v1580_v18  ;;  %v451_v26 = vand.u32 8388607, %v444_v19  ;;  %v242_v27 = vshrl.u32 %v241_v22, 23 }
  0x8d   : > { %v245_v28 = vand.u32 8388607, %v238_v21  ;;  %vm1681_vm14 = vcmp.le.f32.partialorder %v444_v19, 0.7853982 }
  0x8e   : > { %v1378_v29 = vadd.s32 4294967169, %v448_v24  ;;  %v1370_v30 = vadd.s32 4294967169, %v242_v27  ;;  %v550_v31 = vand.u32 2139095040, %v1587_v25  ;;  %v452_v33 = vor.u32 8388608, %v451_v26 }
  0x8f   : > { %v246_v34 = vor.u32 8388608, %v245_v28  ;;  %v547_v41 = vand.u32 2147483647, %v1587_v25 }
  0x90   : > { %v454_v32 = vadd.s32 1, %v1378_v29  ;;  %v248_v35 = vadd.s32 1, %v1370_v30  ;;  %v551_v36 = vshrl.u32 %v550_v31, 23  ;;  %v1597_v44 = vshll.u32 %v452_v33, 8 }
  0x91   : > { %v1599_v46 = vshll.u32 %v246_v34, 8 }
  0x92   : > { %vm455_vm1 = vcmp.gt.s32.totalorder %v454_v32, 0  ;;  %vm249_vm2 = vcmp.gt.s32.totalorder %v248_v35, 0  ;;  %v1382_v38 = vadd.s32 4294967169, %v551_v36 }
  0x93   : > { %v456_v37 = vsel %vm455_vm1, %v454_v32, 0  ;;  %v250_v40 = vsel %vm249_vm2, %v248_v35, 0  ;;  %vm240_vm1 = vcmp.lt.s32.totalorder %v1578_v17, 0 }
  0x94   : > { %v458_v39 = vand.u32 31, %v456_v37  ;;  %v457_v43 = vshrl.u32 %v456_v37, 5  ;;  %v252_v45 = vand.u32 31, %v250_v40  ;;  %v1606_v58 = vshrl.u32 %v250_v40, 5 }
  0x95   : > { %v1608_v59 = vadd.s32 1, %v1382_v38 }
  0x96   : > { %v459_v47 = vsub.s32 32, %v458_v39  ;;  %v461_v49 = vshll.u32 %v1511_v48, %v458_v39  ;;  %v464_v51 = vshll.u32 %v1512_v50, %v458_v39  ;;  %v467_v53 = vshll.u32 %v1513_v52, %v458_v39 }
  0x97   : > { %v470_v55 = vshll.u32 %v1514_v54, %v458_v39  ;;  %v473_v57 = vshll.u32 %v1515_v56, %v458_v39  ;;  %vm476_vm3 = vcmp.lt.s32.totalorder %v457_v43, 1  ;;  %vm477_vm4 = vcmp.lt.s32.totalorder %v457_v43, 2 }
  0x98   : > { %v460_v60 = vshrl.u32 %v1511_v48, %v459_v47  ;;  %v462_v61 = vshrl.u32 %v1512_v50, %v459_v47  ;;  %v465_v62 = vshrl.u32 %v1513_v52, %v459_v47  ;;  %v468_v63 = vshrl.u32 %v1514_v54, %v459_v47 }
  0x99   : > { %v471_v0 = vshrl.u32 %v1515_v56, %v459_v47  ;;  %v474_v2 = vshrl.u32 %v1516_v1, %v459_v47  ;;  %v253_v6 = vsub.s32 32, %v252_v45  ;;  %vm478_vm5 = vcmp.lt.s32.totalorder %v457_v43, 3 }
  0x9a   : > { %v463_v3 = vor.u32 %v462_v61, %v461_v49  ;;  %v466_v4 = vor.u32 %v465_v62, %v464_v51  ;;  %v469_v5 = vor.u32 %v468_v63, %v467_v53  ;;  %vm479_vm6 = vcmp.lt.s32.totalorder %v457_v43, 4 }
  0x9b   : > { %v472_v8 = vor.u32 %v471_v0, %v470_v55  ;;  %v475_v9 = vor.u32 %v474_v2, %v473_v57  ;;  %v255_v22 = vshll.u32 %v1511_v48, %v252_v45  ;;  %v256_v26 = vshrl.u32 %v1512_v50, %v253_v6 }
  0x9c   : > { %v480_v10 = vsel %vm476_vm3, %v460_v60, %v463_v3  ;;  %v481_v11 = vsel %vm479_vm6, %v469_v5, 2102212464  ;;  %v484_v12 = vsel %vm476_vm3, %v463_v3, %v466_v4  ;;  %v488_v13 = vsel %vm476_vm3, %v466_v4, %v469_v5 }
  0x9d   : > { %v482_v14 = vsel %vm478_vm5, %v466_v4, %v481_v11  ;;  %v485_v15 = vsel %vm479_vm6, %v472_v8, 920167782  ;;  %v489_v20 = vsel %vm479_vm6, %v475_v9, 1326507024  ;;  %v258_v27 = vshll.u32 %v1512_v50, %v252_v45 }
  0x9e   : > { %v486_v23 = vsel %vm478_vm5, %v469_v5, %v485_v15  ;;  %v490_v24 = vsel %vm478_vm5, %v472_v8, %v489_v20  ;;  %v483_v28 = vsel %vm477_vm4, %v480_v10, %v482_v14  ;;  %v259_v31 = vshrl.u32 %v1513_v52, %v253_v6 }
  0x9f   : > { %v487_v29 = vsel %vm477_vm4, %v484_v12, %v486_v23  ;;  %v491_v30 = vsel %vm477_vm4, %v488_v13, %v490_v24  ;;  %v257_v36 = vor.u32 %v256_v26, %v255_v22  ;;  %v261_v38 = vshll.u32 %v1513_v52, %v252_v45 }
  0xa0   : > { %v1624_v32 = vmul.u32.u64.low %v1597_v44, %v491_v30  ;;  %v1625_v33 = vmul.u32.u64.high %v1597_v44, %v491_v30, %v1624_v32  ;;  %v1628_v34 = vmul.u32.u64.low %v1597_v44, %v487_v29  ;;  %v1629_v35 = vmul.u32.u64.high %v1597_v44, %v487_v29, %v1628_v34 }
  0xa1   : > { %v260_v37 = vor.u32 %v259_v31, %v258_v27  ;;  %v262_v39 = vshrl.u32 %v1514_v54, %v253_v6  ;;  %v254_v40 = vshrl.u32 %v1511_v48, %v253_v6  ;;  %v264_v43 = vshll.u32 %v1514_v54, %v252_v45 }
  0xa2   : > { %v265_v47 = vshrl.u32 %v1515_v56, %v253_v6  ;;  %v268_v49 = vshrl.u32 %v1516_v1, %v253_v6  ;;  %v499_v51 = vmul.u32 %v1597_v44, %v483_v28  ;;  %v267_v55 = vshll.u32 %v1515_v56, %v252_v45  ;;  %v200_v6 = vpop.permute.xlu0 %199 }
  0xa3   : > { %v263_v53 = vor.u32 %v262_v39, %v261_v38  ;;  %vm270_vm7 = vcmp.lt.s32.totalorder %v1606_v58, 1  ;;  %vm501_vm8 = vc.u32 %v1625_v33, %v1628_v34  ;;  %v502_v57 = vadd.s32 1, %v1629_v35 }
  0xa4   : > { %v266_v60 = vor.u32 %v265_v47, %v264_v43  ;;  %vm271_vm9 = vcmp.lt.s32.totalorder %v1606_v58, 2  ;;  %v269_v61 = vor.u32 %v268_v49, %v267_v55  ;;  %vm272_vm10 = vcmp.lt.s32.totalorder %v1606_v58, 3 }
  0xa5   : > { %vm273_vm11 = vcmp.lt.s32.totalorder %v1606_v58, 4  ;;  %v278_v62 = vsel %vm270_vm7, %v257_v36, %v260_v37  ;;  %v503_v44 = vsel %vm501_vm8, %v502_v57, %v1629_v35  ;;  %v282_v0 = vsel %vm270_vm7, %v260_v37, %v263_v53 }
  0xa6   : > { %v275_v63 = vsel %vm273_vm11, %v263_v53, 2102212464  ;;  %v279_v45 = vsel %vm273_vm11, %v266_v60, 920167782  ;;  %v504_v2 = vadd.s32 %v503_v44, %v499_v51  ;;  %v274_v3 = vsel %vm270_vm7, %v254_v40, %v257_v36 }
  0xa7   : > { %v280_v4 = vsel %vm272_vm10, %v263_v53, %v279_v45  ;;  %v283_v5 = vsel %vm273_vm11, %v269_v61, 1326507024  ;;  %v276_v8 = vsel %vm272_vm10, %v260_v37, %v275_v63  ;;  %vm558_vm12 = vcmp.gt.s32.totalorder %v1608_v59, 0 }
  0xa8   : > { %v281_v9 = vsel %vm271_vm9, %v278_v62, %v280_v4  ;;  %v284_v10 = vsel %vm272_vm10, %v266_v60, %v283_v5  ;;  %v505_v11 = vadd.s32 536870912, %v504_v2  ;;  %v1662_v22 = vmul.f32 %v200_v6, %v1595_v42 }
  0xa9   : > { %v285_v12 = vsel %vm271_vm9, %v282_v0, %v284_v10  ;;  %v1654_v13 = vmul.u32.u64.low %v1599_v46, %v281_v9  ;;  %v1655_v14 = vmul.u32.u64.high %v1599_v46, %v281_v9, %v1654_v13  ;;  %v277_v24 = vsel %vm271_vm9, %v274_v3, %v276_v8 }
  0xaa   : > { %v1658_v15 = vmul.u32.u64.low %v1599_v46, %v285_v12  ;;  %v1659_v20 = vmul.u32.u64.high %v1599_v46, %v285_v12, %v1658_v15  ;;  %v506_v23 = vshrl.u32 %v505_v11, 30  ;;  %v559_v26 = vsel %vm558_vm12, %v1608_v59, 0 }
  0xab   : > { %v296_v28 = vadd.s32 1, %v1655_v14  ;;  %v554_v29 = vand.u32 8388607, %v547_v41  ;;  %v1671_v30 = vadd.s32 16, %v1568_v7  ;;  %v293_v31 = vmul.u32 %v1599_v46, %v277_v24 }
  0xac   : > { %v507_v27 = vshll.u32 %v506_v23, 30  ;;  %vm295_vm13 = vc.u32 %v1659_v20, %v1654_v13  ;;  %v344_v42 = vand.u32 2139095040, %v1662_v22  ;;  %v561_v35 = vand.u32 31, %v559_v26 }
  0xad   : > { %v297_v58 = vsel %vm295_vm13, %v296_v28, %v1655_v14  ;;  %v555_v37 = vor.u32 8388608, %v554_v29  ;;  %v230_v38 = vand.u32 1, %v1671_v30  ;;  %v530_v47 = vsub.s32 4, %v506_v23 }
  0xae   : > { %v508_v32 = vsub.s32 %v504_v2, %v507_v27  ;;  %v298_v59 = vadd.s32 %v297_v58, %v293_v31  ;;  %v345_v40 = vshrl.u32 %v344_v42, 23  ;;  %v228_v49 = vand.u32 1, %v1568_v7 }
  0xaf   : > { %v562_v46 = vsub.s32 32, %v561_v35  ;;  %v341_v55 = vand.u32 2147483647, %v1662_v22  ;;  %v500_v57 = vadd.s32 %v1628_v34, %v1625_v33  ;;  %v1691_v61 = vshrl.u32 %v559_v26, 5 }
  0xb0   : > { %v510_v36 = vsub.s32 0, %v508_v32  ;;  %v299_v39 = vadd.s32 536870912, %v298_v59  ;;  %v1693_v62 = vshll.u32 %v555_v37, 8  ;;  %v1696_v44 = vadd.s32 %v1654_v13, %v1659_v20 }
  0xb1   : > { %v564_v63 = vshll.u32 %v1511_v48, %v561_v35  ;;  %v1374_v45 = vadd.s32 4294967169, %v345_v40  ;;  %v531_v2 = vsel %vm446_vm15, %v530_v47, %v506_v23  ;;  %v567_v3 = vshll.u32 %v1512_v50, %v561_v35 }
  0xb2   : > { %v1379_v43 = vmin.u32 %v510_v36, %v508_v32  ;;  %v1686_v53 = vshrl.u32 %v299_v39, 30  ;;  %v574_v33 = vshrl.u32 %v1515_v56, %v562_v46  ;;  %v565_v4 = vshrl.u32 %v1512_v50, %v562_v46 }
  0xb3   : > { %v568_v5 = vshrl.u32 %v1513_v52, %v562_v46  ;;  %v571_v6 = vshrl.u32 %v1514_v54, %v562_v46  ;;  %v563_v8 = vshrl.u32 %v1511_v48, %v562_v46  ;;  %v573_v9 = vshll.u32 %v1514_v54, %v561_v35 }
  0xb4   : > { %v512_v60 = vclz %v1379_v43  ;;  %v301_v19 = vshll.u32 %v1686_v53, 30  ;;  %v577_v10 = vshrl.u32 %v1516_v1, %v562_v46  ;;  %v1714_v12 = vsel %vm1681_vm14, 0, %v531_v2 }
  0xb5   : > { %v570_v14 = vshll.u32 %v1513_v52, %v561_v35  ;;  %v575_v23 = vor.u32 %v574_v33, %v573_v9  ;;  %v576_v24 = vshll.u32 %v1515_v56, %v561_v35  ;;  %v566_v27 = vor.u32 %v565_v4, %v564_v63 }
  0xb6   : > { %v1380_v0 = vadd.s32 4294967294, %v512_v60  ;;  %v1704_v34 = vsub.s32 %v298_v59, %v301_v19  ;;  %v569_v28 = vor.u32 %v568_v5, %v567_v3  ;;  %v324_v37 = vsub.s32 4, %v1686_v53 }
  0xb7   : > { %v572_v29 = vor.u32 %v571_v6, %v570_v14  ;;  %v578_v59 = vor.u32 %v577_v10, %v576_v24  ;;  %vm579_vm2 = vcmp.lt.s32.totalorder %v1691_v61, 1  ;;  %vm582_vm3 = vcmp.lt.s32.totalorder %v1691_v61, 4 }
  0xb8   : > { %vm1381_vm0 = vcmp.lt.s32.totalorder %v1380_v0, 0  ;;  %v304_v13 = vsub.s32 0, %v1704_v34  ;;  %vm580_vm4 = vcmp.lt.s32.totalorder %v1691_v61, 2  ;;  %v588_v40 = vsel %vm582_vm3, %v575_v23, 920167782 }
  0xb9   : > { %v515_v11 = vsel %vm1381_vm0, 0, %v1380_v0  ;;  %vm581_vm5 = vcmp.lt.s32.totalorder %v1691_v61, 3  ;;  %v591_v47 = vsel %vm579_vm2, %v569_v28, %v572_v29  ;;  %vm1732_vm6 = vcmp.le.f32.partialorder %v238_v21, 0.7853982 }
  0xba   : > { %v516_v15 = vsub.s32 32, %v515_v11  ;;  %v520_v20 = vsub.s32 4294967266, %v515_v11  ;;  %v1371_v26 = vmin.u32 %v304_v13, %v1704_v34  ;;  %v517_v31 = vshll.u32 %v508_v32, %v515_v11 }
  0xbb   : > { %v587_v32 = vsel %vm579_vm2, %v566_v27, %v569_v28  ;;  %v584_v60 = vsel %vm582_vm3, %v572_v29, 2102212464  ;;  %v589_v19 = vsel %vm581_vm5, %v572_v29, %v588_v40  ;;  %v592_v63 = vsel %vm582_vm3, %v578_v59, 1326507024 }
  0xbc   : > { %v518_v42 = vshrl.u32 %v500_v57, %v516_v15  ;;  %v521_v58 = vadd.s32 127, %v520_v20  ;;  %v306_v36 = vclz %v1371_v26  ;;  %v583_v2 = vsel %vm579_vm2, %v563_v8, %v566_v27  ;;  %v215_v27 = vpop.permute.xlu0 %214 }
  0xbd   : > { %v593_v3 = vsel %vm581_vm5, %v575_v23, %v592_v63  ;;  %v590_v21 = vsel %vm580_vm4, %v587_v32, %v589_v19  ;;  %v585_v10 = vsel %vm581_vm5, %v569_v28, %v584_v60  ;;  %v351_v11 = vadd.s32 1, %v1374_v45 }
  0xbe   : > { %v519_v39 = vor.u32 %v518_v42, %v517_v31  ;;  %v522_v35 = vshll.u32 %v521_v58, 23  ;;  %v1372_v43 = vadd.s32 4294967294, %v306_v36  ;;  %v594_v5 = vsel %vm580_vm4, %v591_v47, %v593_v3 }
  0xbf   : > { %v1750_v14 = vmul.u32.u64.low %v1693_v62, %v594_v5  ;;  %v1751_v15 = vmul.u32.u64.high %v1693_v62, %v594_v5, %v1750_v14  ;;  %v1755_v24 = vmul.u32.u64.low %v1693_v62, %v590_v21  ;;  %v1756_v26 = vmul.u32.u64.high %v1693_v62, %v590_v21, %v1755_v24 }
  0xc0   : > { %v523_v46 = vor.u32 4788187, %v522_v35  ;;  %v526_v0 = vcvt.s32.f32 %v519_v39  ;;  %vm1373_vm7 = vcmp.lt.s32.totalorder %v1372_v43, 0  ;;  %v325_v45 = vsel %vm240_vm1, %v324_v37, %v1686_v53 }
  0xc1   : > { %v309_v4 = vsel %vm1373_vm7, 0, %v1372_v43  ;;  %vm352_vm8 = vcmp.gt.s32.totalorder %v351_v11, 0  ;;  %v1054_v59 = vadd.s32 3, %v1714_v12  ;;  %vm604_vm9 = vc.u32 %v1751_v15, %v1755_v24 }
  0xc2   : > { %v524_v33 = vand.u32 2147483647, %v523_v46  ;;  %v310_v6 = vsub.s32 32, %v309_v4  ;;  %v314_v9 = vsub.s32 4294967266, %v309_v4  ;;  %v311_v8 = vshll.u32 %v1704_v34, %v309_v4 }
  0xc3   : > { %v1764_v34 = vand.u32 8388607, %v341_v55  ;;  %v353_v42 = vsel %vm352_vm8, %v351_v11, 0  ;;  %v1774_v53 = vmul.f32 %v215_v27, %v1580_v18  ;;  %v327_v61 = vsel %vm1732_vm6, 0, %v325_v45 }
  0xc4   : > { %v527_v13 = vmul.f32 %v526_v0, %v524_v33  ;;  %v312_v20 = vshrl.u32 %v1696_v44, %v310_v6  ;;  %v315_v23 = vadd.s32 127, %v314_v9  ;;  %v586_v44 = vsel %vm580_vm4, %v583_v2, %v585_v10 }
  0xc5   : > { %v605_v39 = vadd.s32 1, %v1756_v26  ;;  %v1783_v35 = vand.u32 3, %v1714_v12  ;;  %v602_v40 = vmul.u32 %v1693_v62, %v586_v44  ;;  %v355_v43 = vand.u32 31, %v353_v42 }
  0xc6   : > { %v528_v29 = vxor.u32 2147483648, %v527_v13  ;;  %v313_v28 = vor.u32 %v312_v20, %v311_v8  ;;  %v316_v31 = vshll.u32 %v315_v23, 23  ;;  %v1787_v51 = vand.u32 3, %v1054_v59 }
  0xc7   : > { %v606_v47 = vsel %vm604_vm9, %v605_v39, %v1756_v26  ;;  %v846_v46 = vadd.s32 3, %v327_v61  ;;  %v1789_v19 = vsub.s32 32, %v355_v43  ;;  %v1791_v0 = vshrl.u32 %v353_v42, 5 }
  0xc8   : > { %v529_v58 = vsel %vm446_vm15, %v528_v29, %v527_v13  ;;  %v317_v37 = vor.u32 4788187, %v316_v31  ;;  %v320_v32 = vcvt.s32.f32 %v313_v28  ;;  %v607_v60 = vadd.s32 %v606_v47, %v602_v40 }
  0xc9   : > { %v532_v36 = vsel %vm1681_vm14, %v1576_v16, %v529_v58  ;;  %v358_v12 = vshll.u32 %v1511_v48, %v355_v43  ;;  %v361_v2 = vshll.u32 %v1512_v50, %v355_v43  ;;  %vm542_vm10 = vcmp.eq.s32.totalorder %v1783_v35, 2 }
  0xca   : > { %1466 = vcosq.f32 %v532_v36  ;;  %v318_v18 = vand.u32 2147483647, %v317_v37  ;;  %v608_v62 = vadd.s32 536870912, %v607_v60  ;;  %v359_v3 = vshrl.u32 %v1512_v50, %v1789_v19 }
  0xcb   : > { %1468 = vsinq.f32 %v532_v36  ;;  %v362_v33 = vshrl.u32 %v1513_v52, %v1789_v19  ;;  %v364_v4 = vshll.u32 %v1513_v52, %v355_v43  ;;  %vm539_vm11 = vcmp.eq.s32.totalorder %v1783_v35, 0 }
  0xcc   : > { %v321_v63 = vmul.f32 %v320_v32, %v318_v18  ;;  %v365_v5 = vshrl.u32 %v1514_v54, %v1789_v19  ;;  %v367_v6 = vshll.u32 %v1514_v54, %v355_v43  ;;  %v368_v9 = vshrl.u32 %v1515_v56, %v1789_v19 }
  0xcd   : > { %vm1809_vm12 = vcmp.eq.s32.totalorder %v230_v38, 1  ;;  %vm538_vm13 = vcmp.lt.s32.totalorder %v1783_v35, 2  ;;  %vm1056_vm14 = vcmp.lt.s32.totalorder %v1787_v51, 2  ;;  %vm1057_vm15 = vcmp.eq.s32.totalorder %v1787_v51, 0 }
  0xce   : > { %v322_v21 = vxor.u32 2147483648, %v321_v63  ;;  %v1816_v11 = vand.u32 3, %v327_v61  ;;  %v1818_v13 = vshrl.u32 %v608_v62, 30  ;;  %v1820_v8 = vor.u32 %v359_v3, %v358_v12 }
  0xcf   : > { %vm536_vm0 = vweird.f32 %v1576_v16  ;;  %v363_v38 = vor.u32 %v362_v33, %v361_v2  ;;  %v366_v14 = vor.u32 %v365_v5, %v364_v4  ;;  %v369_v20 = vor.u32 %v368_v9, %v367_v6 }
  0xd0   : > { %v323_v30 = vsel %vm240_vm1, %v322_v21, %v321_v63  ;;  %v610_v26 = vshll.u32 %v1818_v13, 30  ;;  %v349_v27 = vor.u32 8388608, %v1764_v34  ;;  %vm376_vm2 = vcmp.lt.s32.totalorder %v1791_v0, 4 }
  0xd1   : > { %v326_v23 = vsel %vm1732_vm6, %v1578_v17, %v323_v30  ;;  %v1831_v29 = vand.u32 3, %v846_v46  ;;  %v371_v45 = vshrl.u32 %v1516_v1, %v1789_v19  ;;  %v382_v28 = vsel %vm376_vm2, %v369_v20, 920167782 }
  0xd2   : > { %1470 = vcosq.f32 %v326_v23  ;;  %v1837_v44 = vsub.s32 %v607_v60, %v610_v26  ;;  %vm373_vm1 = vcmp.lt.s32.totalorder %v1791_v0, 1  ;;  %vm375_vm3 = vcmp.lt.s32.totalorder %v1791_v0, 3 }
  0xd3   : > { %1472 = vsinq.f32 %v326_v23  ;;  %v370_v42 = vshll.u32 %v1515_v56, %v355_v43  ;;  %v381_v58 = vsel %vm373_vm1, %v1820_v8, %v363_v38  ;;  %v383_v59 = vsel %vm375_vm3, %v366_v14, %v382_v28 }
  0xd4   : > { %v1467_v31 = vpop.eup %1466  ;;  %vm1060_vm4 = vcmp.eq.s32.totalorder %v1787_v51, 2  ;;  %v613_v37 = vsub.s32 0, %v1837_v44  ;;  %v1850_v61 = vshll.u32 %v349_v27, 8  ;;  %vm336_vm5 = vcmp.eq.s32.totalorder %v1816_v11, 2 }
  0xd5   : > { %v1469_v57 = vpop.eup %1468  ;;  %v543_v34 = vxor.u32 2147483648, %v1467_v31  ;;  %v372_v43 = vor.u32 %v371_v45, %v370_v42  ;;  %vm374_vm6 = vcmp.lt.s32.totalorder %v1791_v0, 2  ;;  %vm333_vm7 = vcmp.eq.s32.totalorder %v1816_v11, 0 }
  0xd6   : > { %v540_v36 = vxor.u32 2147483648, %v1469_v57  ;;  %v1383_v47 = vmin.u32 %v613_v37, %v1837_v44  ;;  %v384_v46 = vsel %vm374_vm6, %v381_v58, %v383_v59  ;;  %vm1875_vm8 = vcmp.eq.s32.totalorder %v228_v49, 1 }
  0xd7   : > { %v544_v39 = vsel %vm542_vm10, %v543_v34, %v1469_v57  ;;  %v1062_v40 = vsel %vm1060_vm4, %v543_v34, %v1469_v57  ;;  %vm332_vm9 = vcmp.lt.s32.totalorder %v1816_v11, 2  ;;  %vm848_vm10 = vcmp.lt.s32.totalorder %v1831_v29, 2 }
  0xd8   : > { %v541_v18 = vsel %vm539_vm11, %v1467_v31, %v540_v36  ;;  %v1059_v32 = vsel %vm1057_vm15, %v1467_v31, %v540_v36  ;;  %v357_v2 = vshrl.u32 %v1511_v48, %v1789_v19  ;;  %v378_v35 = vsel %vm376_vm2, %v366_v14, 2102212464 }
  0xd9   : > { %v545_v60 = vsel %vm538_vm13, %v541_v18, %v544_v39  ;;  %v1063_v63 = vsel %vm1056_vm14, %v1059_v32, %v1062_v40  ;;  %vm330_vm11 = vweird.f32 %v1578_v17  ;;  %v615_v49 = vclz %v1383_v47 }
  0xda   : > { %v546_v51 = vsel %vm536_vm0, nan, %v545_v60  ;;  %v1064_v62 = vsel %vm536_vm0, nan, %v1063_v63  ;;  %v385_v3 = vsel %vm373_vm1, %v363_v38, %v366_v14  ;;  %v386_v19 = vsel %vm376_vm2, %v372_v43, 1326507024 }
  0xdb   : > { %v1275_v33 = vsel %vm1809_vm12, %v546_v51, %v1064_v62  ;;  %v1897_v4 = vmul.u32.u64.low %v1850_v61, %v384_v46  ;;  %v1898_v21 = vmul.u32.u64.high %v1850_v61, %v384_v46, %v1897_v4  ;;  %vm849_vm13 = vcmp.eq.s32.totalorder %v1831_v29, 0 }
  0xdc   : > { %1280 = vst [vmem:[%s1867_s30 + $0x10] sm:$0xff] %v1275_v33  ;;  %vm852_vm14 = vcmp.eq.s32.totalorder %v1831_v29, 2  ;;  %v603_v16 = vadd.s32 %v1755_v24, %v1751_v15  ;;  %v1384_v5 = vadd.s32 4294967294, %v615_v49  ;;  %v1471_v6 = vpop.eup %1470  ;;  %v633_v9 = vsub.s32 4, %v1818_v13 }
  0xdd   : > { %v377_v10 = vsel %vm373_vm1, %v357_v2, %v1820_v8  ;;  %v379_v30 = vsel %vm375_vm3, %v363_v38, %v378_v35  ;;  %v387_v14 = vsel %vm375_vm3, %v369_v20, %v386_v19  ;;  %v1473_v23 = vpop.eup %1472  ;;  %v337_v26 = vxor.u32 2147483648, %v1471_v6 }
  0xde   : > { %vm1385_vm12 = vcmp.lt.s32.totalorder %v1384_v5, 0  ;;  %v388_v15 = vsel %vm374_vm6, %v385_v3, %v387_v14  ;;  %v653_v24 = vand.u32 2139095040, %v1774_v53  ;;  %v334_v27 = vxor.u32 2147483648, %v1473_v23 }
  0xdf   : > { %v618_v45 = vsel %vm1385_vm12, 0, %v1384_v5  ;;  %v1918_v28 = vmul.u32.u64.low %v1850_v61, %v388_v15  ;;  %v1919_v31 = vmul.u32.u64.high %v1850_v61, %v388_v15, %v1918_v28  ;;  %v338_v8 = vsel %vm336_vm5, %v337_v26, %v1473_v23 }
  0xe0   : > { %v854_v38 = vsel %vm852_vm14, %v337_v26, %v1473_v23  ;;  %v619_v20 = vsub.s32 32, %v618_v45  ;;  %v380_v57 = vsel %vm374_vm6, %v377_v10, %v379_v30  ;;  %v335_v34 = vsel %vm333_vm7, %v1471_v6, %v334_v27 }
  0xe1   : > { %v851_v42 = vsel %vm849_vm13, %v1471_v6, %v334_v27  ;;  %v623_v58 = vsub.s32 4294967266, %v618_v45  ;;  %v399_v59 = vadd.s32 1, %v1898_v21  ;;  %v339_v36 = vsel %vm332_vm9, %v335_v34, %v338_v8 }
  0xe2   : > { %v855_v37 = vsel %vm848_vm10, %v851_v42, %v854_v38  ;;  %v621_v39 = vshrl.u32 %v603_v16, %v619_v20  ;;  %v654_v40 = vshrl.u32 %v653_v24, 23  ;;  %v340_v0 = vsel %vm330_vm11, nan, %v339_v36 }
  0xe3   : > { %v856_v43 = vsel %vm330_vm11, nan, %v855_v37  ;;  %v620_v18 = vshll.u32 %v1837_v44, %v618_v45  ;;  %v624_v32 = vadd.s32 127, %v623_v58  ;;  %v396_v11 = vmul.u32 %v1850_v61, %v380_v57 }
  0xe4   : > { %v1273_v47 = vsel %vm1875_vm8, %v340_v0, %v856_v43  ;;  %vm398_vm15 = vc.u32 %v1919_v31, %v1897_v4  ;;  %v1386_v29 = vadd.s32 4294967169, %v654_v40  ;;  %vm549_vm0 = vcmp.lt.s32.totalorder %v1587_v25, 0 }
  0xe5   : > { %1278 = vst [vmem:[%s1867_s30] sm:$0xff] %v1273_v47  ;;  %v622_v46 = vor.u32 %v621_v39, %v620_v18  ;;  %v625_v60 = vshll.u32 %v624_v32, 23  ;;  %v400_v17 = vsel %vm398_vm15, %v399_v59, %v1898_v21  ;;  %v634_v44 = vsel %vm549_vm0, %v633_v9, %v1818_v13 }
  0xe6   : > { %v401_v63 = vadd.s32 %v400_v17, %v396_v11  ;;  %v660_v12 = vadd.s32 1, %v1386_v29  ;;  %vm1954_vm2 = vcmp.le.f32.partialorder %v547_v41, 0.7853982  ;;  %v650_v51 = vand.u32 2147483647, %v1774_v53 }
  0xe7   : > { %v626_v2 = vor.u32 4788187, %v625_v60  ;;  %v629_v49 = vcvt.s32.f32 %v622_v46  ;;  %v636_v3 = vsel %vm1954_vm2, 0, %v634_v44  ;;  %v226_v13 = vadd.s32 24, %v1568_v7 }
  0xe8   : > { %v402_v35 = vadd.s32 536870912, %v401_v63  ;;  %vm661_vm1 = vcmp.gt.s32.totalorder %v660_v12, 0  ;;  %v1158_v41 = vadd.s32 3, %v636_v3  ;;  %v657_v6 = vand.u32 8388607, %v650_v51 }
  0xe9   : > { %v627_v62 = vand.u32 2147483647, %v626_v2  ;;  %v662_v33 = vsel %vm661_vm1, %v660_v12, 0  ;;  %v231_v30 = vand.u32 1, %v226_v13  ;;  %v1967_v14 = vand.u32 3, %v636_v3 }
  0xea   : > { %v1962_v19 = vshrl.u32 %v402_v35, 30  ;;  %v664_v21 = vand.u32 31, %v662_v33  ;;  %v1979_v28 = vand.u32 3, %v1158_v41  ;;  %v658_v38 = vor.u32 8388608, %v657_v6 }
  0xeb   : > { %v630_v16 = vmul.f32 %v629_v49, %v627_v62  ;;  %v663_v58 = vshrl.u32 %v662_v33, 5  ;;  %vm645_vm3 = vcmp.eq.s32.totalorder %v1967_v14, 2  ;;  %vm642_vm4 = vcmp.eq.s32.totalorder %v1967_v14, 0 }
  0xec   : > { %v404_v5 = vshll.u32 %v1962_v19, 30  ;;  %v665_v9 = vsub.s32 32, %v664_v21  ;;  %v667_v20 = vshll.u32 %v1511_v48, %v664_v21  ;;  %v670_v57 = vshll.u32 %v1512_v50, %v664_v21 }
  0xed   : > { %v631_v10 = vxor.u32 2147483648, %v630_v16  ;;  %v673_v34 = vshll.u32 %v1513_v52, %v664_v21  ;;  %v676_v59 = vshll.u32 %v1514_v54, %v664_v21  ;;  %v679_v43 = vshll.u32 %v1515_v56, %v664_v21 }
  0xee   : > { %v1969_v23 = vsub.s32 %v401_v63, %v404_v5  ;;  %v668_v15 = vshrl.u32 %v1512_v50, %v665_v9  ;;  %v671_v24 = vshrl.u32 %v1513_v52, %v665_v9  ;;  %v674_v27 = vshrl.u32 %v1514_v54, %v665_v9 }
  0xef   : > { %v632_v26 = vsel %vm549_vm0, %v631_v10, %v630_v16  ;;  %v677_v40 = vshrl.u32 %v1515_v56, %v665_v9  ;;  %v680_v18 = vshrl.u32 %v1516_v1, %v665_v9  ;;  %v397_v50 = vadd.s32 %v1897_v4, %v1919_v31 }
  0xf0   : > { %v635_v45 = vsel %vm1954_vm2, %v1587_v25, %v632_v26  ;;  %v407_v8 = vsub.s32 0, %v1969_v23  ;;  %v669_v36 = vor.u32 %v668_v15, %v667_v20  ;;  %v672_v37 = vor.u32 %v671_v24, %v670_v57 }
  0xf1   : > { %1474 = vcosq.f32 %v635_v45  ;;  %v675_v39 = vor.u32 %v674_v27, %v673_v34  ;;  %v666_v52 = vshrl.u32 %v1511_v48, %v665_v9  ;;  %v678_v32 = vor.u32 %v677_v40, %v676_v59 }
  0xf2   : > { %1476 = vsinq.f32 %v635_v45  ;;  %v1375_v42 = vmin.u32 %v407_v8, %v1969_v23  ;;  %v698_v47 = vshll.u32 %v658_v38, 8  ;;  %vm1161_vm5 = vcmp.eq.s32.totalorder %v1979_v28, 0 }
  0xf3   : > { %v681_v11 = vor.u32 %v680_v18, %v679_v43  ;;  %vm682_vm6 = vcmp.lt.s32.totalorder %v663_v58, 1  ;;  %vm685_vm7 = vcmp.lt.s32.totalorder %v663_v58, 4  ;;  %vm1996_vm8 = vcmp.eq.s32.totalorder %v231_v30, 1 }
  0xf4   : > { %v409_v0 = vclz %v1375_v42  ;;  %vm641_vm9 = vcmp.lt.s32.totalorder %v1967_v14, 2  ;;  %vm684_vm10 = vcmp.lt.s32.totalorder %v663_v58, 3  ;;  %v687_v1 = vsel %vm685_vm7, %v675_v39, 2102212464 }
  0xf5   : > { %v690_v4 = vsel %vm682_vm6, %v669_v36, %v672_v37  ;;  %v691_v48 = vsel %vm685_vm7, %v678_v32, 920167782  ;;  %vm683_vm13 = vcmp.lt.s32.totalorder %v663_v58, 2  ;;  %v694_v29 = vsel %vm682_vm6, %v672_v37, %v675_v39 }
  0xf6   : > { %v1376_v54 = vadd.s32 4294967294, %v409_v0  ;;  %v692_v31 = vsel %vm684_vm10, %v675_v39, %v691_v48  ;;  %v686_v60 = vsel %vm682_vm6, %v666_v52, %v669_v36  ;;  %v695_v44 = vsel %vm685_vm7, %v681_v11, 1326507024 }
  0xf7   : > { %v693_v17 = vsel %vm683_vm13, %v690_v4, %v692_v31  ;;  %v688_v2 = vsel %vm684_vm10, %v672_v37, %v687_v1  ;;  %v696_v61 = vsel %vm684_vm10, %v678_v32, %v695_v44  ;;  %vm1164_vm14 = vcmp.eq.s32.totalorder %v1979_v28, 2 }
  0xf8   : > { %vm1377_vm11 = vcmp.lt.s32.totalorder %v1376_v54, 0  ;;  %v697_v62 = vsel %vm683_vm13, %v694_v29, %v696_v61  ;;  %v2004_v49 = vmul.u32.u64.low %v698_v47, %v693_v17  ;;  %v2005_v3 = vmul.u32.u64.high %v698_v47, %v693_v17, %v2004_v49 }
  0xf9   : > { %v412_v46 = vsel %vm1377_vm11, 0, %v1376_v54  ;;  %v689_v6 = vsel %vm683_vm13, %v686_v60, %v688_v2  ;;  %v2010_v9 = vmul.u32.u64.low %v698_v47, %v697_v62  ;;  %v2011_v10 = vmul.u32.u64.high %v698_v47, %v697_v62, %v2010_v9 }
  0xfa   : > { %v413_v63 = vsub.s32 32, %v412_v46  ;;  %v417_v12 = vsub.s32 4294967266, %v412_v46  ;;  %v414_v21 = vshll.u32 %v1969_v23, %v412_v46  ;;  %vm1160_vm12 = vcmp.lt.s32.totalorder %v1979_v28, 2 }
  0xfb   : > { %v1475_v35 = vpop.eup %1474  ;;  %v708_v45 = vadd.s32 1, %v2005_v3  ;;  %vm639_vm15 = vweird.f32 %v1587_v25  ;;  %v705_v42 = vmul.u32 %v698_v47, %v689_v6  ;;  %vm707_vm0 = vc.u32 %v2011_v10, %v2004_v49 }
  0xfc   : > { %v1477_v33 = vpop.eup %1476  ;;  %v646_v13 = vxor.u32 2147483648, %v1475_v35  ;;  %v415_v16 = vshrl.u32 %v397_v50, %v413_v63  ;;  %v418_v41 = vadd.s32 127, %v417_v12  ;;  %v427_v14 = vsub.s32 4, %v1962_v19 }
  0xfd   : > { %v643_v5 = vxor.u32 2147483648, %v1477_v33  ;;  %v709_v36 = vsel %vm707_vm0, %v708_v45, %v2005_v3  ;;  %vm343_vm2 = vcmp.lt.s32.totalorder %v1662_v22, 0  ;;  %vm342_vm1 = vcmp.le.f32.partialorder %v341_v55, 0.7853982 }
  0xfe   : > { %v647_v30 = vsel %vm645_vm3, %v646_v13, %v1477_v33  ;;  %v1166_v26 = vsel %vm1164_vm14, %v646_v13, %v1477_v33  ;;  %v416_v15 = vor.u32 %v415_v16, %v414_v21  ;;  %v419_v24 = vshll.u32 %v418_v41, 23 }
  0xff   : > { %v644_v27 = vsel %vm642_vm4, %v1475_v35, %v643_v5  ;;  %v1163_v23 = vsel %vm1161_vm5, %v1475_v35, %v643_v5  ;;  %v710_v25 = vadd.s32 %v709_v36, %v705_v42  ;;  %v428_v18 = vsel %vm343_vm2, %v427_v14, %v1962_v19 }
 0x100   : > { %v648_v8 = vsel %vm641_vm9, %v644_v27, %v647_v30  ;;  %v1167_v38 = vsel %vm1160_vm12, %v1163_v23, %v1166_v26  ;;  %v420_v20 = vor.u32 4788187, %v419_v24  ;;  %v423_v59 = vcvt.s32.f32 %v416_v15 }
 0x101   : > { %v649_v57 = vsel %vm639_vm15, nan, %v648_v8  ;;  %v1168_v34 = vsel %vm639_vm15, nan, %v1167_v38  ;;  %v711_v39 = vadd.s32 536870912, %v710_v25  ;;  %v430_v32 = vsel %vm342_vm1, 0, %v428_v18 }
 0x102   : > { %v1276_v58 = vsel %vm1996_vm8, %v649_v57, %v1168_v34  ;;  %v421_v28 = vand.u32 2147483647, %v420_v20  ;;  %v224_v54 = vadd.s32 8, %v1568_v7  ;;  %v950_v56 = vadd.s32 3, %v430_v32 }
 0x103   : > { %1281 = vst [vmem:[%s1867_s30 + $0x18] sm:$0xff] %v1276_v58  ;;  %v712_v0 = vshrl.u32 %v711_v39, 30  ;;  %v434_v48 = vand.u32 3, %v430_v32  ;;  %v706_v61 = vadd.s32 %v2004_v49, %v2011_v10  ;;  %vm433_vm11 = vweird.f32 %v1662_v22 }
 0x104   : > { %v424_v37 = vmul.f32 %v423_v59, %v421_v28  ;;  %v229_v4 = vand.u32 1, %v224_v54  ;;  %v951_v29 = vand.u32 3, %v950_v56  ;;  %vm652_vm13 = vcmp.lt.s32.totalorder %v1774_v53, 0 }
 0x105   : > { %v713_v52 = vshll.u32 %v712_v0, 30  ;;  %vm435_vm4 = vcmp.lt.s32.totalorder %v434_v48, 2  ;;  %vm436_vm5 = vcmp.eq.s32.totalorder %v434_v48, 0  ;;  %vm439_vm6 = vcmp.eq.s32.totalorder %v434_v48, 2 }
 0x106   : > { %v425_v40 = vxor.u32 2147483648, %v424_v37  ;;  %vm2037_vm3 = vcmp.eq.s32.totalorder %v229_v4, 1  ;;  %vm953_vm8 = vcmp.eq.s32.totalorder %v951_v29, 0  ;;  %vm956_vm9 = vcmp.eq.s32.totalorder %v951_v29, 2 }
 0x107   : > { %v714_v47 = vsub.s32 %v710_v25, %v713_v52  ;;  %vm952_vm10 = vcmp.lt.s32.totalorder %v951_v29, 2  ;;  %v736_v23 = vsub.s32 4, %v712_v0  ;;  %vm651_vm14 = vcmp.le.f32.partialorder %v650_v51, 0.7853982 }
 0x108   : > { %v426_v43 = vsel %vm343_vm2, %v425_v40, %v424_v37  ;;  %v227_v57 = vadd.s32 32, %v1568_v7 }
 0x109   : > { %v429_v50 = vsel %vm342_vm1, %v1662_v22, %v426_v43  ;;  %v716_v11 = vsub.s32 0, %v714_v47  ;;  %v737_v8 = vsel %vm652_vm13, %v736_v23, %v712_v0 }
 0x10a   : > { %1478 = vcosq.f32 %v429_v50  ;;  %v739_v20 = vsel %vm651_vm14, 0, %v737_v8  ;;  %v232_v42 = vand.u32 1, %v227_v57 }
 0x10b   : > { %1480 = vsinq.f32 %v429_v50  ;;  %v1387_v1 = vmin.u32 %v716_v11, %v714_v47  ;;  %v1262_v34 = vadd.s32 3, %v739_v20  ;;  %v743_v58 = vand.u32 3, %v739_v20 }
 0x10c   : > { %vm2053_vm12 = vcmp.eq.s32.totalorder %v232_v42, 1 }
 0x10d   : > { %v718_v31 = vclz %v1387_v1  ;;  %v1263_v28 = vand.u32 3, %v1262_v34  ;;  %vm748_vm15 = vcmp.eq.s32.totalorder %v743_v58, 2  ;;  %vm745_vm2 = vcmp.eq.s32.totalorder %v743_v58, 0 }
 0x10f   : > { %v1388_v55 = vadd.s32 4294967294, %v718_v31  ;;  %vm1268_vm0 = vcmp.eq.s32.totalorder %v1263_v28, 2  ;;  %vm1265_vm1 = vcmp.eq.s32.totalorder %v1263_v28, 0 }
 0x111   : > { %vm1389_vm7 = vcmp.lt.s32.totalorder %v1388_v55, 0 }
 0x112   : > { %v721_v63 = vsel %vm1389_vm7, 0, %v1388_v55 }
 0x113   : > { %v722_v35 = vsub.s32 32, %v721_v63  ;;  %v726_v33 = vsub.s32 4294967266, %v721_v63  ;;  %v723_v6 = vshll.u32 %v714_v47, %v721_v63 }
 0x114   : > { %v1479_v46 = vpop.eup %1478 }
 0x115   : > { %v1481_v60 = vpop.eup %1480  ;;  %v440_v17 = vxor.u32 2147483648, %v1479_v46  ;;  %v724_v16 = vshrl.u32 %v706_v61, %v722_v35  ;;  %v727_v9 = vadd.s32 127, %v726_v33 }
 0x116   : > { %v437_v44 = vxor.u32 2147483648, %v1481_v60 }
 0x117   : > { %v441_v12 = vsel %vm439_vm6, %v440_v17, %v1481_v60  ;;  %v958_v2 = vsel %vm956_vm9, %v440_v17, %v1481_v60  ;;  %v725_v49 = vor.u32 %v724_v16, %v723_v6  ;;  %v728_v10 = vshll.u32 %v727_v9, 23 }
 0x118   : > { %v438_v62 = vsel %vm436_vm5, %v1479_v46, %v437_v44  ;;  %v955_v3 = vsel %vm953_vm8, %v1479_v46, %v437_v44  ;;  %vm742_vm5 = vweird.f32 %v1774_v53 }
 0x119   : > { %v442_v13 = vsel %vm435_vm4, %v438_v62, %v441_v12  ;;  %v959_v21 = vsel %vm952_vm10, %v955_v3, %v958_v2  ;;  %v729_v26 = vor.u32 4788187, %v728_v10  ;;  %v732_v24 = vcvt.s32.f32 %v725_v49 }
 0x11a   : > { %v443_v41 = vsel %vm433_vm11, nan, %v442_v13  ;;  %v960_v5 = vsel %vm433_vm11, nan, %v959_v21  ;;  %vm1264_vm4 = vcmp.lt.s32.totalorder %v1263_v28, 2 }
 0x11b   : > { %v1274_v30 = vsel %vm2037_vm3, %v443_v41, %v960_v5  ;;  %v730_v15 = vand.u32 2147483647, %v729_v26  ;;  %vm744_vm3 = vcmp.lt.s32.totalorder %v743_v58, 2 }
 0x11c   : > { %1279 = vst [vmem:[%s1867_s30 + $0x8] sm:$0xff] %v1274_v30 }
 0x11d   : > { %v733_v27 = vmul.f32 %v732_v24, %v730_v15 }
 0x11f   : > { %v734_v22 = vxor.u32 2147483648, %v733_v27 }
 0x121   : > { %v735_v45 = vsel %vm652_vm13, %v734_v22, %v733_v27 }
 0x122   : > { %v738_v38 = vsel %vm651_vm14, %v1774_v53, %v735_v45 }
 0x123   : > { %1482 = vcosq.f32 %v738_v38 }
 0x124   : > { %1484 = vsinq.f32 %v738_v38 }
 0x12d   : > { %v1483_v59 = vpop.eup %1482 }
 0x12e   : > { %v1485_v36 = vpop.eup %1484  ;;  %v749_v25 = vxor.u32 2147483648, %v1483_v59 }
 0x12f   : > { %v746_v51 = vxor.u32 2147483648, %v1485_v36 }
 0x130   : > { %v750_v14 = vsel %vm748_vm15, %v749_v25, %v1485_v36  ;;  %v1270_v39 = vsel %vm1268_vm0, %v749_v25, %v1485_v36 }
 0x131   : > { %v747_v7 = vsel %vm745_vm2, %v1483_v59, %v746_v51  ;;  %v1267_v40 = vsel %vm1265_vm1, %v1483_v59, %v746_v51 }
 0x132   : > { %v751_v0 = vsel %vm744_vm3, %v747_v7, %v750_v14  ;;  %v1271_v43 = vsel %vm1264_vm4, %v1267_v40, %v1270_v39 }
 0x133   : > { %v752_v18 = vsel %vm742_vm5, nan, %v751_v0  ;;  %v1272_v50 = vsel %vm742_vm5, nan, %v1271_v43 }
 0x134   : > { %v1277_v52 = vsel %vm2053_vm12, %v752_v18, %v1272_v50 }
 0x135   : > { %1282 = vst [vmem:[%s1867_s30 + $0x20] sm:$0xf] %v1277_v52 }
 0x136 PF: > { %s12_s11 = sadd.s32 1, %s1508_s11   ;;  %s2089_s9 = smov %s1504_s10 }
 0x137   : > { %p9_p5 = scmp.ge.s32.totalorder %s12_s11, 4   ;;  %s2090_s10 = smov %s2092_s12 }
 0x139   :  { %11 = sbr.rel (!%p9_p5) target bundleno = 2 (0x2), region = 58 }

</bundles_post_ra>
